<compile_context>
chip_gen: v5e
topology: v5e:2x2
jax: 0.10.0
libtpu: 0.0.40
codegen_flags: <defaults>
</compile_context>

<pallas_src>
import math
import jax
import jax.numpy as jnp
from jax.experimental import pallas as pl
from jax.experimental.pallas import tpu as pltpu


def _round_up(x, m):
    return ((x + m - 1) // m) * m


def _attention_kernel(r_ref, item_ref, mask_ref, out_ref):
    """One grid step = one batch tile of TB rows.

    r_ref    : (TB, D)    f32   reduced query vector per row (precomputed)
    item_ref : (TB, N, D) bf16/f32 item embeddings
    mask_ref : (TB, N)    f32   0/1 mask
    out_ref  : (TB, D)    f32   entity embedding (lane-dense store)
    """
    it = item_ref[...].astype(jnp.float32)                  # (TB, N, D)
    r = r_ref[...]                                          # (TB, D)

    # scores[b, n] = <item[b, n, :], r[b, :]>  -- VPU multiply + lane reduce over D.
    # (N and D are tiny here; a degenerate per-batch MXU matvec would be slower.)
    scores = jnp.sum(it * r[:, None, :], axis=-1)           # (TB, N)
    scores = scores - jnp.max(scores, axis=-1, keepdims=True)

    att = jnp.exp(scores) * mask_ref[...]                   # (TB, N)
    denom = jnp.sum(att, axis=-1, keepdims=True)            # (TB, 1)
    denom = jnp.where(denom < 1e-7, denom + 1.0, denom)
    weight = att / denom                                    # (TB, N)

    # entity_embedding[b, :] = sum_n weight[b, n] * item[b, n, :]
    out_ref[...] = jnp.sum(weight[:, :, None] * it, axis=1)  # (TB, D)


def attention_layer_forward(item_embedding, query_embedding, mask,
                            wq, bq, wr, input_dim, head_num,
                            item_dtype=jnp.bfloat16):
    """AEM forward.

    item_embedding : (B, N, D)
    query_embedding: (B, D) or (B, 1, D)
    mask           : (B, N) or (B, N, 1), 0/1 (float or bool)
    wq             : (D*H, D)  query_projection.weight
    bq             : (D*H,)    query_projection.bias
    wr             : (1, H)    reduce_projection.weight
    returns        : (B, D) float32
    """
    B, N, D = item_embedding.shape
    H = head_num
    assert D == input_dim

    if query_embedding.ndim == 3:
        query_embedding = query_embedding.reshape(B, D)
    query_embedding = query_embedding.astype(jnp.float32)
    mask2 = mask.reshape(B, N).astype(jnp.float32)

    # ---- Query-side chain: one dense batched XLA matmul for the whole batch. ----
    # r[b, d] = sum_h tanh(q @ Wq^T + b)[b, d*H + h] * wr[0, h]
    pq = jnp.tanh(query_embedding @ wq.T.astype(jnp.float32)
                  + bq.astype(jnp.float32))                          # (B, D*H)
    r = jnp.einsum('bdh,h->bd', pq.reshape(B, D, H),
                   wr.reshape(H).astype(jnp.float32))                # (B, D)

    # HBM-dominant tensor in bf16 (compute stays f32 inside the kernel).
    item = item_embedding.astype(item_dtype)

    # ---- Batch tiling. ----
    if B <= 16:
        TB = B                        # tiny batch: single grid step, no padding tricks
    else:
        # ~half the batch per step (keeps >= 2 grid steps so v7x's 2nd TC is used),
        # capped at 128 rows, multiple of 8, and sized so the double-buffered item
        # tile stays well under v7x's 64 MiB (32 MiB scoped) VMEM.
        TB = min(128, _round_up(-(-B // 2), 8))
        bytes_per_row = (N * D * jnp.dtype(item_dtype).itemsize      # item tile
                         + (2 * D + N) * 4)                          # r + out + mask
        vmem_budget = 16 * 1024 * 1024
        TB = max(8, min(TB, max(8, (vmem_budget // (2 * bytes_per_row)) // 8 * 8)))

    B_pad = _round_up(B, TB)
    if B_pad != B:
        pad = B_pad - B
        item = jnp.pad(item, ((0, pad), (0, 0), (0, 0)))
        mask2 = jnp.pad(mask2, ((0, pad), (0, 0)))       # mask=0 -> weight=0 -> out=0
        r = jnp.pad(r, ((0, pad), (0, 0)))

    grid = (B_pad // TB,)

    out = pl.pallas_call(
        _attention_kernel,
        out_shape=jax.ShapeDtypeStruct((B_pad, D), jnp.float32),
        grid_spec=pltpu.PrefetchScalarGridSpec(
            num_scalar_prefetch=0,
            grid=grid,
            in_specs=[
                pl.BlockSpec((TB, D), lambda b: (b, 0)),         # r
                pl.BlockSpec((TB, N, D), lambda b: (b, 0, 0)),   # item (bf16)
                pl.BlockSpec((TB, N), lambda b: (b, 0)),         # mask
            ],
            out_specs=pl.BlockSpec((TB, D), lambda b: (b, 0)),
        ),
        compiler_params=pltpu.CompilerParams(
            dimension_semantics=("parallel",)),
    )(r, item, mask2)

    return out[:B]


def reference_forward(item_embedding, query_embedding, mask, wq, bq, wr, D, H):
    """Pure-JAX replica of the PyTorch AEM forward for verification."""
    B, N, _ = item_embedding.shape
    pq = jnp.tanh(query_embedding @ wq.T + bq)                 # (B, D*H)
    pq = pq.reshape(B, D, H)                                   # (B, D, H)
    dotted = jnp.einsum('bnd,bdh->bnh', item_embedding, pq)    # (B, N, H)
    reduced = dotted @ wr.T                                    # (B, N, 1)
    scores = reduced - jnp.max(reduced, axis=1, keepdims=True)
    att = jnp.exp(scores) * mask
    denom = jnp.sum(att, axis=1, keepdims=True)
    weight = att / jnp.where(denom < 1e-7, denom + 1.0, denom)
    return jnp.sum(weight * item_embedding, axis=1)            # (B, D)


if __name__ == "__main__":
    B, N, D, H = 2, 8, 32, 4

    key = jax.random.PRNGKey(0)
    k_item, k_query, k_mask, k_wq, k_bq = jax.random.split(key, 5)

    item_embedding = jax.random.normal(k_item, (B, N, D), jnp.float32)
    query_embedding = jax.random.normal(k_query, (B, D), jnp.float32)
    mask = (jax.random.uniform(k_mask, (B, N, 1)) > 0.3).astype(jnp.float32)

    # Deterministic parameter init following reset_parameters() semantics.
    a_w = math.sqrt(3.0) * math.sqrt(2.0 / float(D + D))
    a_b = math.sqrt(3.0) * math.sqrt(2.0 / float(D + 1))
    wq = jax.random.uniform(k_wq, (D * H, D), jnp.float32, -a_w, a_w)  # query_projection.weight
    bq = jax.random.uniform(k_bq, (D * H,), jnp.float32, -a_b, a_b)    # query_projection.bias
    wr = jnp.full((1, H), math.sqrt(3.0), jnp.float32)                 # reduce_projection.weight

    # 1) Exact-semantics path (item kept in f32) vs. exact reference.
    out_f32 = attention_layer_forward(item_embedding, query_embedding, mask,
                                      wq, bq, wr, input_dim=D, head_num=H,
                                      item_dtype=jnp.float32)
    out_f32 = jax.block_until_ready(out_f32)
    ref = reference_forward(item_embedding, query_embedding, mask, wq, bq, wr, D, H)
    assert out_f32.shape == (B, D)
    assert jnp.allclose(out_f32, ref, atol=1e-4, rtol=1e-4), (
        f"f32 path: max abs err {jnp.max(jnp.abs(out_f32 - ref))}")

    # 2) Default bf16-item path (halves HBM traffic) vs. reference with the same
    #    bf16 rounding applied to the item tensor (all other math in f32).
    out_bf16 = attention_layer_forward(item_embedding, query_embedding, mask,
                                       wq, bq, wr, input_dim=D, head_num=H)
    out_bf16 = jax.block_until_ready(out_bf16)
    item_q = item_embedding.astype(jnp.bfloat16).astype(jnp.float32)
    ref_q = reference_forward(item_q, query_embedding, mask, wq, bq, wr, D, H)
    assert out_bf16.shape == (B, D)
    assert jnp.allclose(out_bf16, ref_q, atol=1e-4, rtol=1e-4), (
        f"bf16 path: max abs err {jnp.max(jnp.abs(out_bf16 - ref_q))}")

    print("KERNEL_OK")
</pallas_src>

<mosaic_0001>
module attributes {stable_mosaic.version = 11 : i64} {
  func.func @_attention_kernel(%arg0: i32, %arg1: memref<2x32xf32, #tpu.memory_space<vmem>>, %arg2: memref<2x8x32xf32, #tpu.memory_space<vmem>>, %arg3: memref<2x8xf32, #tpu.memory_space<vmem>>, %arg4: memref<2x32xf32, #tpu.memory_space<vmem>>) attributes {dimension_semantics = [#tpu.dimension_semantics<parallel>], iteration_bounds = array<i64: 1>, scalar_prefetch = 0 : i64, scratch_operands = 0 : i64, tpu.core_type = #tpu.core_type<tc>, window_params = [{transform_indices = @transform_0, window_bounds = array<i64: 2, 32>}, {transform_indices = @transform_1, window_bounds = array<i64: 2, 8, 32>}, {transform_indices = @transform_2, window_bounds = array<i64: 2, 8>}, {transform_indices = @transform_3, window_bounds = array<i64: 2, 32>}]} {
    %c0 = arith.constant 0 : index
    %c0_0 = arith.constant 0 : index
    %c0_1 = arith.constant 0 : index
    %0 = vector.load %arg2[%c0, %c0_0, %c0_1] : memref<2x8x32xf32, #tpu.memory_space<vmem>>, vector<2x8x32xf32>
    %c0_2 = arith.constant 0 : index
    %c0_3 = arith.constant 0 : index
    %1 = vector.load %arg1[%c0_2, %c0_3] : memref<2x32xf32, #tpu.memory_space<vmem>>, vector<2x32xf32>
    %2 = vector.shape_cast %1 : vector<2x32xf32> to vector<2x1x32xf32>
    %3 = vector.broadcast %2 : vector<2x1x32xf32> to vector<2x8x32xf32>
    %4 = arith.mulf %0, %3 : vector<2x8x32xf32>
    %cst = arith.constant dense<0.000000e+00> : vector<2x8xf32>
    %5 = vector.multi_reduction <add>, %4, %cst [2] : vector<2x8x32xf32> to vector<2x8xf32>
    %cst_4 = arith.constant dense<0xFF800000> : vector<2xf32>
    %6 = vector.multi_reduction <maximumf>, %5, %cst_4 [1] : vector<2x8xf32> to vector<2xf32>
    %7 = vector.shape_cast %6 : vector<2xf32> to vector<2x1xf32>
    %8 = vector.broadcast %7 : vector<2x1xf32> to vector<2x8xf32>
    %9 = arith.subf %5, %8 : vector<2x8xf32>
    %10 = math.exp %9 : vector<2x8xf32>
    %c0_5 = arith.constant 0 : index
    %c0_6 = arith.constant 0 : index
    %11 = vector.load %arg3[%c0_5, %c0_6] : memref<2x8xf32, #tpu.memory_space<vmem>>, vector<2x8xf32>
    %12 = arith.mulf %10, %11 : vector<2x8xf32>
    %cst_7 = arith.constant dense<0.000000e+00> : vector<2xf32>
    %13 = vector.multi_reduction <add>, %12, %cst_7 [1] : vector<2x8xf32> to vector<2xf32>
    %14 = vector.shape_cast %13 : vector<2xf32> to vector<2x1xf32>
    %cst_8 = arith.constant 1.000000e-07 : f32
    %15 = vector.broadcast %cst_8 : f32 to vector<2x1xf32>
    %16 = arith.cmpf olt, %14, %15 : vector<2x1xf32>
    %cst_9 = arith.constant 1.000000e+00 : f32
    %17 = vector.broadcast %cst_9 : f32 to vector<2x1xf32>
    %18 = arith.addf %14, %17 : vector<2x1xf32>
    %19 = arith.select %16, %18, %14 : vector<2x1xi1>, vector<2x1xf32>
    %20 = vector.broadcast %19 : vector<2x1xf32> to vector<2x8xf32>
    %21 = arith.divf %12, %20 : vector<2x8xf32>
    %22 = vector.shape_cast %21 : vector<2x8xf32> to vector<2x8x1xf32>
    %23 = vector.broadcast %22 : vector<2x8x1xf32> to vector<2x8x32xf32>
    %24 = arith.mulf %23, %0 : vector<2x8x32xf32>
    %cst_10 = arith.constant dense<0.000000e+00> : vector<2x32xf32>
    %25 = vector.multi_reduction <add>, %24, %cst_10 [1] : vector<2x8x32xf32> to vector<2x32xf32>
    %c0_11 = arith.constant 0 : index
    %c0_12 = arith.constant 0 : index
    %26 = vector.load %arg4[%c0_11, %c0_12] : memref<2x32xf32, #tpu.memory_space<vmem>>, vector<2x32xf32>
    tpu.vector_store %arg4[%c0_11, %c0_12], %25 {strides = array<i32>} : memref<2x32xf32, #tpu.memory_space<vmem>>, vector<2x32xf32>,
    return
  }
  func.func @transform_0(%arg0: i32) -> (i32, i32) {
    %c0_i32 = arith.constant 0 : i32
    %c0_i32_0 = arith.constant 0 : i32
    return %arg0, %c0_i32 : i32, i32
  }
  func.func @transform_1(%arg0: i32) -> (i32, i32, i32) {
    %c0_i32 = arith.constant 0 : i32
    %c0_i32_0 = arith.constant 0 : i32
    %c0_i32_1 = arith.constant 0 : i32
    return %arg0, %c0_i32, %c0_i32_0 : i32, i32, i32
  }
  func.func @transform_2(%arg0: i32) -> (i32, i32) {
    %c0_i32 = arith.constant 0 : i32
    %c0_i32_0 = arith.constant 0 : i32
    return %arg0, %c0_i32 : i32, i32
  }
  func.func @transform_3(%arg0: i32) -> (i32, i32) {
    %c0_i32 = arith.constant 0 : i32
    %c0_i32_0 = arith.constant 0 : i32
    return %arg0, %c0_i32 : i32, i32
  }
}

</mosaic_0001>

<bundles_post_ra>
// kernel: tpu_custom_call.1
= control target key start
LH: loop header
LB: loop body
LE: loop exit
PB: predicated region body
PF: predicated region fallthrough
CT: control target
= control target key end

     0   :  { %8 = vsyncpa [#allocation3], 0  ;;  %s401_s0 = inlined_call_operand.hbm [shape: f32[2,32], index: 0, kind: input, shape index: {}]   ;;  %s402_s1 = inlined_call_operand.hbm [shape: f32[2,8,32], index: 1, kind: input, shape index: {}]   ;;  %s403_s2 = inlined_call_operand.hbm [shape: f32[2,8], index: 2, kind: input, shape index: {}]   ;;  %s404_s3 = inlined_call_operand.hbm [shape: f32[2,32], index: 3, kind: output, shape index: {}]  }
   0x1   :  { %9 = vsyncpa [#allocation6], 0  ;;  %s26_s14 = sshll.u32 %s402_s1, 4  ;;  %s27_s14 = int_to_ptr.hbm [resolvable:$true] %s26_s14 }
   0x2   :  { %10 = vsyncpa [#allocation4], 0  ;;  %s345_s15 = smov [#allocation5]   ;;  %s16_s19 = sshll.u32 %s401_s0, 4  ;;  %s17_s19 = int_to_ptr.hbm [resolvable:$true] %s16_s19 }
   0x3   :  { %s28_s16 = sshll.u32 %s345_s15, 4  ;;  %s346_s20 = smov 128   ;;  %s29_s16 = int_to_ptr.vmem [resolvable:$true] %s28_s16 }
   0x4   :  { %s347_s21 = smov 8   ;;  %s348_s22 = smov [#allocation2]  }
   0x5   :  { %34 = dma.hbm_to_vmem [thread:$0]  %s27_s14, 256, %s29_s16, [#allocation6], %s346_s20, %s346_s20, %s347_s21  }
   0x6   :  { %s18_s23 = sshll.u32 %s348_s22, 4  ;;  %s40_s26 = sshll.u32 %s403_s2, 4  ;;  %s19_s23 = int_to_ptr.vmem [resolvable:$true] %s18_s23  ;;  %s41_s26 = int_to_ptr.hbm [resolvable:$true] %s40_s26 }
   0x7   :  { %21 = dma.hbm_to_vmem [thread:$0]  %s17_s19, 32, %s19_s23, [#allocation3]  }
   0x8   :  { %s349_s1 = smov [#allocation7]  }
   0x9   :  { %s42_s27 = sshll.u32 %s349_s1, 4  ;;  %s43_s27 = int_to_ptr.vmem [resolvable:$true] %s42_s27 }
   0xa   :  { %45 = dma.hbm_to_vmem [thread:$0]  %s41_s26, 32, %s43_s27, [#allocation6]  }
   0xb   :  { %339 = dma.done.wait [#allocation3], 32  }
   0xc   :  { %340 = vsyncadd [#allocation3], 4294967264 }
   0xd   :  { %341 = dma.done.wait [#allocation6], 288  }
   0xe   :  { %342 = vsyncadd [#allocation6], 4294967008  ;;  %v381_v0 = vld [vmem:[#allocation5] sm:$0xff]  ;;  %v60_v1 = vld [vmem:[#allocation2] sm:$0x3]  ;;  %vm69_vm0 = vcmask 261120   ;;  %v78_v10 = vlaneseq }
   0xf   :  { %v63_v2 = vperm.slane %v60_v1, 0  ;;  %v62_v3 = vrot.slane %v60_v1, 1  ;;  %v384_v6 = vld [vmem:[#allocation5 + $0x8] sm:$0xff]  ;;  %v100_v14 = vld [vmem:[#allocation7] sm:$0x3]  ;;  %vm82_vm1 = vcmask 1041409  }
  0x10   :  { %v104_v11 = vshrl.u32 %v78_v10, 7  ;;  %v79_v13 = vand.u32 127, %v78_v10  ;;  %v109_v15 = vperm.slane %v100_v14, 1  ;;  %vm85_vm2 = vcmask 58368   ;;  %s351_s0 = smov [#allocation8]   ;;  %s212_s30 = sshll.u32 %s404_s3, 4  ;;  %s213_s30 = int_to_ptr.hbm [resolvable:$true] %s212_s30 }
  0x11   :  { %v67_v4 = vmul.f32 %v63_v2, %v381_v0  ;;  %v64_v5 = vperm.slane %v62_v3, 0  ;;  %v102_v21 = vperm.slane %v100_v14, 0  ;;  %v350_v22 = vmov 0   ;;  %s210_s2 = sshll.u32 %s351_s0, 4  ;;  %s211_s2 = int_to_ptr.vmem [resolvable:$true] %s210_s2 }
  0x12   :  { %230 = vset.pattern.permute.xlu1 %v104_v11  ;;  %231 = vset.pattern.permute.xlu2 %v104_v11  ;;  %vm203_vm12 = vcmask 254976  }
  0x13   :  { %v70_v7 = vsel %vm69_vm0, %v67_v4, 0.0  ;;  %v68_v8 = vmul.f32 %v64_v5, %v384_v6  ;;  %233 = vset.pattern.permute.xlu0 %v350_v22 }
  0x14   :  { %71 = vadd.xlane.f32.xlu0 %v70_v7 }
  0x15   :  { %v73_v9 = vsel %vm69_vm0, %v68_v8, 0.0 }
  0x1a   :  { %114 = vperm.xlu2 %231, %v109_v15  }
  0x1c   :  { %74 = vadd.xlane.f32.xlu0 %v73_v9 }
  0x22   :  { %232 = vset.pattern.permute.xlu2 %v350_v22 }
  0x74   :  { %v115_v29 = vpop.permute.xlu2 %114 }
  0x87   :  { %v72_v12 = vpop.xlane.xlu0 %71 }
  0x88   :  { %v80_v17 = vperm.slane %v72_v12, %v79_v13 }
  0x8f   :  { %v75_v16 = vpop.xlane.xlu0 %74 }
  0x90   :  { %v81_v18 = vperm.slane %v75_v16, %v79_v13 }
  0x92   :  { %v83_v19 = vsel %vm82_vm1, %v81_v18, %v80_v17 }
  0x93   :  { %v86_v20 = vsel %vm85_vm2, %v83_v19, -inf }
  0x94   :  { %87 = vmax.xlane.f32.xlu1 %v86_v20 }
  0xad   :  { %107 = vperm.xlu1 %230, %v102_v21  }
  0xb5   :  { %234 = vset.pattern.permute.xlu1 %v350_v22 }
 0x107   :  { %v88_v23 = vpop.xlane.xlu1 %87 }
 0x108   :  { %v91_v24 = vperm.slane %v88_v23, 1  ;;  %v90_v27 = vperm.slane %v88_v23, 0 }
 0x10a   :  { %v95_v25 = vsub.f32 %v75_v16, %v91_v24  ;;  %v94_v28 = vsub.f32 %v72_v12, %v90_v27 }
 0x10c   :  { %v98_v26 = vmul.f32 1.442695, %v95_v25  ;;  %v96_v31 = vmul.f32 1.442695, %v94_v28 }
 0x10e   :  { %235 = vpow2.f32 %v98_v26 }
 0x10f   :  { %237 = vpow2.f32 %v96_v31 }
 0x114   :  { %v236_v30 = vpop.eup %235 }
 0x115   :  { %v119_v32 = vmul.f32 %v236_v30, %v115_v29  ;;  %v238_v33 = vpop.eup %237 }
 0x117   :  { %126 = vperm.xlu0 %233, %v119_v32  }
 0x11f   :  { %v108_v34 = vpop.permute.xlu1 %107 }
 0x120   :  { %v118_v35 = vmul.f32 %v238_v33, %v108_v34 }
 0x122   :  { %123 = vperm.xlu2 %232, %v118_v35  }
 0x17c   :  { %v124_v36 = vpop.permute.xlu2 %123 }
 0x17d   :  { %v128_v38 = vperm.slane %v124_v36, %v79_v13 }
 0x189   :  { %v127_v37 = vpop.permute.xlu0 %126 }
 0x18a   :  { %v129_v39 = vperm.slane %v127_v37, %v79_v13 }
 0x18c   :  { %v130_v40 = vsel %vm82_vm1, %v129_v39, %v128_v38 }
 0x18d   :  { %v132_v41 = vsel %vm85_vm2, %v130_v40, 0.0 }
 0x18e   :  { %133 = vadd.xlane.f32.xlu2 %v132_v41 }
 0x201   :  { %v134_v42 = vpop.xlane.xlu2 %133 }
 0x202   :  { %vm135_vm3 = vcmp.lt.f32.partialorder %v134_v42, 1e-07  ;;  %v136_v43 = vadd.f32 1.0, %v134_v42 }
 0x204   :  { %v137_v44 = vsel %vm135_vm3, %v136_v43, %v134_v42 }
 0x205   :  { %v139_v45 = vperm.slane %v137_v44, 0  ;;  %v140_v46 = vperm.slane %v137_v44, 1 }
 0x207   :  { %239 = vrcp.f32 %v139_v45  ;;  %v154_v52 = vand.u32 2147483648, %v139_v45  ;;  %v152_v55 = vand.u32 2147483647, %v139_v45  ;;  %vm148_vm5 = vweird.f32 %v139_v45 }
 0x208   :  { %241 = vrcp.f32 %v140_v46  ;;  %v169_v62 = vand.u32 2147483648, %v140_v46  ;;  %vm163_vm9 = vweird.f32 %v140_v46  ;;  %v167_v1 = vand.u32 2147483647, %v140_v46 }
 0x209   :  { %v155_v58 = vor.u32 1.1754944e-38, %v154_v52  ;;  %vm153_vm7 = vcmp.eq.f32.partialorder %v152_v55, 8.507059e+37 }
 0x20a   :  { %v170_v3 = vor.u32 1.1754944e-38, %v169_v62  ;;  %vm168_vm11 = vcmp.eq.f32.partialorder %v167_v1, 8.507059e+37 }
 0x20d   :  { %v240_v47 = vpop.eup %239 }
 0x20e   :  { %v242_v48 = vpop.eup %241  ;;  %v144_v49 = vmul.f32 %v240_v47, %v139_v45  ;;  %vm149_vm4 = vweird.f32 %v240_v47 }
 0x20f   :  { %v159_v50 = vmul.f32 %v242_v48, %v140_v46  ;;  %vm150_vm6 = vmor %vm148_vm5, %vm149_vm4  ;;  %vm164_vm8 = vweird.f32 %v242_v48 }
 0x210   :  { %v145_v51 = vsub.f32 1.0, %v144_v49  ;;  %vm165_vm10 = vmor %vm163_vm9, %vm164_vm8 }
 0x211   :  { %v160_v53 = vsub.f32 1.0, %v159_v50 }
 0x212   :  { %v146_v54 = vmul.f32 %v240_v47, %v145_v51 }
 0x213   :  { %v161_v56 = vmul.f32 %v242_v48, %v160_v53 }
 0x214   :  { %v147_v57 = vadd.f32 %v240_v47, %v146_v54 }
 0x215   :  { %v162_v60 = vadd.f32 %v242_v48, %v161_v56 }
 0x216   :  { %v151_v59 = vsel %vm150_vm6, %v240_v47, %v147_v57 }
 0x217   :  { %v156_v61 = vsel %vm153_vm7, %v155_v58, %v151_v59  ;;  %v166_v2 = vsel %vm165_vm10, %v242_v48, %v162_v60 }
 0x218   :  { %v157_v63 = vmul.f32 %v156_v61, %v118_v35  ;;  %v171_v4 = vsel %vm168_vm11, %v170_v3, %v166_v2 }
 0x219   :  { %v172_v5 = vmul.f32 %v171_v4, %v119_v32 }
 0x21a   :  { %175 = vperm.xlu1 %234, %v157_v63  }
 0x222   :  { %180 = vperm.xlu1 %234, %v172_v5  }
 0x28c   :  { %v176_v7 = vpop.permute.xlu1 %175 }
 0x28d   :  { %v183_v8 = vmul.f32 %v176_v7, %v381_v0 }
 0x28f   :  { %v185_v9 = vsel %vm69_vm0, %v183_v8, 0.0 }
 0x290   :  { %v186_v10 = vrot.slane %v185_v9, 4 }
 0x292   :  { %v187_v11 = vadd.f32 %v186_v10, %v185_v9 }
 0x294   :  { %v181_v12 = vpop.permute.xlu1 %180  ;;  %v188_v14 = vrot.slane %v187_v11, 2 }
 0x295   :  { %v184_v13 = vmul.f32 %v181_v12, %v384_v6 }
 0x296   :  { %v189_v17 = vadd.f32 %v188_v14, %v187_v11 }
 0x297   :  { %v192_v15 = vsel %vm69_vm0, %v184_v13, 0.0 }
 0x298   :  { %v193_v16 = vrot.slane %v192_v15, 4  ;;  %v190_v20 = vrot.slane %v189_v17, 1 }
 0x29a   :  { %v194_v18 = vadd.f32 %v193_v16, %v192_v15  ;;  %v191_v0 = vadd.f32 %v190_v20, %v189_v17 }
 0x29c   :  { %v195_v19 = vrot.slane %v194_v18, 2 }
 0x29e   :  { %v196_v21 = vadd.f32 %v195_v19, %v194_v18 }
 0x2a0   :  { %v197_v22 = vrot.slane %v196_v21, 1 }
 0x2a2   :  { %v198_v23 = vadd.f32 %v197_v22, %v196_v21 }
 0x2a4   :  { %v201_v6 = vsel %vm82_vm1, %v198_v23, %v191_v0 }
 0x2a5   :  { %204 = vst.msk [vmem:[#allocation8] sm:$0x3] %vm203_vm12, %v201_v6 }
 0x2a6   :  { %215 = dma.vmem_to_hbm [thread:$0]  %s211_s2, 32, %s213_s30, [#allocation4]  }
 0x2a7   :  { %343 = dma.done.wait [#allocation4], 32  }
 0x2a8   :  { %344 = vsyncadd [#allocation4], 4294967264 }
 0x2a9   :  { %220 = vsyncpa [#allocation3], 1 }
 0x2aa   :  { %221 = vsyncpa [#allocation6], 1 }
 0x2ab   :  { %222 = vsyncpa [#allocation4], 1 }

</bundles_post_ra>
